<compile_context>
chip_gen: v7x
topology: tpu7x:2x2x1
jax: 0.10.0
libtpu: 0.0.40
codegen_flags: <defaults>
</compile_context>

<pallas_src>
import math

import jax
import jax.numpy as jnp
from jax.experimental import pallas as pl
from jax.experimental.pallas import tpu as pltpu

B = 4            # example batch of sequences handled by one pallas_call
SEQ = 8          # sequence length
D_IN = 6         # Linear in_features
D_OUT = 25       # Linear out_features
D_PAD = 128      # lane-dense padded projection width (cols >= D_OUT are zero)
SCALE = float(math.sqrt(math.sqrt(6.0)))   # forward divides by 1 / 6**0.25
DROP_P = 0.5


def _gelu(x):
    # TODO(synk): torch F.gelu default is the exact erf-based GELU; the tanh
    # approximation is used for guaranteed lowering everywhere (max abs err ~1e-3).
    c = math.sqrt(2.0 / math.pi)
    return 0.5 * x * (1.0 + jnp.tanh(c * (x + 0.044715 * x * x * x)))


def sdpa_kernel(x_ref, wt_ref, drop_ref, out_ref):
    x = x_ref[0]            # (SEQ, D_IN) f32
    wt = wt_ref[...]        # (D_IN, D_PAD) pre-transposed, zero-padded weight

    # qkv projection + GELU; padded columns stay exactly 0 (gelu(0) == 0)
    z = _gelu(jnp.dot(x, wt, preferred_element_type=jnp.float32))   # (SEQ, D_PAD)

    # q = k = v = z; contract the last dims directly (no materialized z.T)
    s = jax.lax.dot_general(
        z, z, (((1,), (1,)), ((), ())),
        preferred_element_type=jnp.float32) * SCALE                  # (SEQ, SEQ)

    # softmax along the last dim
    m = jnp.max(s, axis=-1, keepdims=True)
    e = jnp.exp(s - m)
    p = e / jnp.sum(e, axis=-1, keepdims=True)

    # dropout(p=0.5, training): mask already carries the 1/(1-p) scale (0 or 2)
    d = p * drop_ref[0]

    # attention output: lane-dense (SEQ, D_PAD) unmasked store
    out_ref[0] = jnp.dot(d, z, preferred_element_type=jnp.float32)


@jax.jit
def model_forward(x1, w, drop_scale):
    """x1: (B, SEQ, D_IN) f32, w: (D_OUT, D_IN) f32, drop_scale: (B, SEQ, SEQ) f32."""
    b = x1.shape[0]
    # pre-transpose + zero-pad the weight to a lane-dense (D_IN, 128) slab
    wt = jnp.zeros((D_IN, D_PAD), jnp.float32).at[:, :D_OUT].set(w.T)

    out = pl.pallas_call(
        sdpa_kernel,
        grid=(b,),
        out_shape=jax.ShapeDtypeStruct((b, SEQ, D_PAD), jnp.float32),
        in_specs=[
            pl.BlockSpec((1, SEQ, D_IN), lambda i: (i, 0, 0)),     # x  (per batch)
            pl.BlockSpec((D_IN, D_PAD), lambda i: (0, 0)),         # W^T (resident)
            pl.BlockSpec((1, SEQ, SEQ), lambda i: (i, 0, 0)),      # dropout scale
        ],
        out_specs=pl.BlockSpec((1, SEQ, D_PAD), lambda i: (i, 0, 0)),
        compiler_params=pltpu.CompilerParams(
            dimension_semantics=("parallel",)),                    # 2-TC shard on v7x
    )(x1, wt, drop_scale)

    return out[:, :, :D_OUT]                                       # (B, SEQ, D_OUT)


if __name__ == "__main__":
    key = jax.random.PRNGKey(0)
    kx, kw, kd = jax.random.split(key, 3)

    # deterministic example inputs (Linear(6, 25, bias=False))
    x1 = jax.random.normal(kx, (B, SEQ, D_IN), dtype=jnp.float32)
    w = jax.random.normal(kw, (D_OUT, D_IN), dtype=jnp.float32) * (1.0 / math.sqrt(D_IN))

    # dropout p=0.5 (training mode): keep-mask folded with the 1/(1-p) scale.
    # TODO(synk): torch's dropout RNG stream cannot be reproduced; mask comes
    # from jax.random (host-side) instead of the in-kernel PRNG for portability.
    keep = jax.random.bernoulli(kd, 1.0 - DROP_P, (B, SEQ, SEQ))
    drop_scale = keep.astype(jnp.float32) * (1.0 / (1.0 - DROP_P))

    out = model_forward(x1, w, drop_scale)
    jax.block_until_ready(out)

    # pure-JAX reference using the identical dropout mask
    z_ref = _gelu(jnp.einsum("bsd,od->bso", x1, w))
    s_ref = jnp.einsum("bqo,bko->bqk", z_ref, z_ref) * SCALE
    p_ref = jax.nn.softmax(s_ref, axis=-1)
    ref = jnp.einsum("bqk,bko->bqo", p_ref * drop_scale, z_ref)

    assert out.shape == (B, SEQ, D_OUT), out.shape
    assert out.dtype == jnp.float32
    assert jnp.allclose(out, ref, rtol=1e-3, atol=1e-3), float(jnp.max(jnp.abs(out - ref)))
    print("KERNEL_OK")
</pallas_src>

<mosaic_0001>
module attributes {stable_mosaic.version = 11 : i64} {
  func.func @sdpa_kernel(%arg0: i32, %arg1: memref<1x8x6xf32, #tpu.memory_space<vmem>>, %arg2: memref<6x128xf32, #tpu.memory_space<vmem>>, %arg3: memref<1x8x8xf32, #tpu.memory_space<vmem>>, %arg4: memref<1x8x128xf32, #tpu.memory_space<vmem>>) attributes {dimension_semantics = [#tpu.dimension_semantics<parallel>], iteration_bounds = array<i64: 4>, scalar_prefetch = 0 : i64, scratch_operands = 0 : i64, tpu.core_type = #tpu.core_type<tc>, window_params = [{transform_indices = @transform_0, window_bounds = array<i64: 1, 8, 6>}, {pipeline_mode = #tpu.pipeline_mode<synchronous>, transform_indices = @transform_1, window_bounds = array<i64: 6, 128>}, {transform_indices = @transform_2, window_bounds = array<i64: 1, 8, 8>}, {transform_indices = @transform_3, window_bounds = array<i64: 1, 8, 128>}]} {
    %c0 = arith.constant 0 : index
    %c0_0 = arith.constant 0 : index
    %c0_1 = arith.constant 0 : index
    %0 = vector.load %arg1[%c0, %c0_0, %c0_1] : memref<1x8x6xf32, #tpu.memory_space<vmem>>, vector<1x8x6xf32>
    %1 = vector.shape_cast %0 : vector<1x8x6xf32> to vector<8x6xf32>
    %c0_2 = arith.constant 0 : index
    %c0_3 = arith.constant 0 : index
    %2 = vector.load %arg2[%c0_2, %c0_3] : memref<6x128xf32, #tpu.memory_space<vmem>>, vector<6x128xf32>
    %cst = arith.constant dense<0.000000e+00> : vector<8x128xf32>
    %3 = tpu.matmul %1, %2, %cst {dimension_numbers = #tpu.dot_dimension_numbers<[1], [0], [0], [1], [0, 0, 1, 1], [], []>} : vector<8x6xf32>, vector<6x128xf32>, vector<8x128xf32> -> vector<8x128xf32>
    %cst_4 = arith.constant 5.000000e-01 : f32
    %4 = vector.broadcast %cst_4 : f32 to vector<8x128xf32>
    %5 = arith.mulf %4, %3 : vector<8x128xf32>
    %cst_5 = arith.constant 4.471500e-02 : f32
    %6 = vector.broadcast %cst_5 : f32 to vector<8x128xf32>
    %7 = arith.mulf %6, %3 : vector<8x128xf32>
    %8 = arith.mulf %7, %3 : vector<8x128xf32>
    %9 = arith.mulf %8, %3 : vector<8x128xf32>
    %10 = arith.addf %3, %9 : vector<8x128xf32>
    %cst_6 = arith.constant 0.797884583 : f32
    %11 = vector.broadcast %cst_6 : f32 to vector<8x128xf32>
    %12 = arith.mulf %11, %10 : vector<8x128xf32>
    %13 = math.tanh %12 : vector<8x128xf32>
    %cst_7 = arith.constant 1.000000e+00 : f32
    %14 = vector.broadcast %cst_7 : f32 to vector<8x128xf32>
    %15 = arith.addf %14, %13 : vector<8x128xf32>
    %16 = arith.mulf %5, %15 : vector<8x128xf32>
    %cst_8 = arith.constant dense<0.000000e+00> : vector<8x8xf32>
    %17 = tpu.matmul %16, %16, %cst_8 {dimension_numbers = #tpu.dot_dimension_numbers<[1], [1], [0], [0], [0, 0, 1, 0], [], []>} : vector<8x128xf32>, vector<8x128xf32>, vector<8x8xf32> -> vector<8x8xf32>
    %cst_9 = arith.constant 1.56508458 : f32
    %18 = vector.broadcast %cst_9 : f32 to vector<8x8xf32>
    %19 = arith.mulf %17, %18 : vector<8x8xf32>
    %cst_10 = arith.constant dense<0xFF800000> : vector<8xf32>
    %20 = vector.multi_reduction <maximumf>, %19, %cst_10 [1] : vector<8x8xf32> to vector<8xf32>
    %21 = vector.shape_cast %20 : vector<8xf32> to vector<8x1xf32>
    %22 = vector.broadcast %21 : vector<8x1xf32> to vector<8x8xf32>
    %23 = arith.subf %19, %22 : vector<8x8xf32>
    %24 = math.exp %23 : vector<8x8xf32>
    %cst_11 = arith.constant dense<0.000000e+00> : vector<8xf32>
    %25 = vector.multi_reduction <add>, %24, %cst_11 [1] : vector<8x8xf32> to vector<8xf32>
    %26 = vector.shape_cast %25 : vector<8xf32> to vector<8x1xf32>
    %27 = vector.broadcast %26 : vector<8x1xf32> to vector<8x8xf32>
    %28 = arith.divf %24, %27 : vector<8x8xf32>
    %c0_12 = arith.constant 0 : index
    %c0_13 = arith.constant 0 : index
    %c0_14 = arith.constant 0 : index
    %29 = vector.load %arg3[%c0_12, %c0_13, %c0_14] : memref<1x8x8xf32, #tpu.memory_space<vmem>>, vector<1x8x8xf32>
    %30 = vector.shape_cast %29 : vector<1x8x8xf32> to vector<8x8xf32>
    %31 = arith.mulf %28, %30 : vector<8x8xf32>
    %cst_15 = arith.constant dense<0.000000e+00> : vector<8x128xf32>
    %32 = tpu.matmul %31, %16, %cst_15 {dimension_numbers = #tpu.dot_dimension_numbers<[1], [0], [0], [1], [0, 0, 1, 1], [], []>} : vector<8x8xf32>, vector<8x128xf32>, vector<8x128xf32> -> vector<8x128xf32>
    %c0_16 = arith.constant 0 : index
    %c0_17 = arith.constant 0 : index
    %c0_18 = arith.constant 0 : index
    %33 = vector.load %arg4[%c0_16, %c0_17, %c0_18] : memref<1x8x128xf32, #tpu.memory_space<vmem>>, vector<1x8x128xf32>
    %34 = vector.shape_cast %33 : vector<1x8x128xf32> to vector<8x128xf32>
    %35 = vector.shape_cast %32 : vector<8x128xf32> to vector<1x8x128xf32>
    tpu.vector_store %arg4[%c0_16, %c0_17, %c0_18], %35 {strides = array<i32>} : memref<1x8x128xf32, #tpu.memory_space<vmem>>, vector<1x8x128xf32>,
    return
  }
  func.func @transform_0(%arg0: i32) -> (i32, i32, i32) {
    %c0_i32 = arith.constant 0 : i32
    %c0_i32_0 = arith.constant 0 : i32
    %c0_i32_1 = arith.constant 0 : i32
    return %arg0, %c0_i32, %c0_i32_0 : i32, i32, i32
  }
  func.func @transform_1(%arg0: i32) -> (i32, i32) {
    %c0_i32 = arith.constant 0 : i32
    %c0_i32_0 = arith.constant 0 : i32
    %c0_i32_1 = arith.constant 0 : i32
    return %c0_i32, %c0_i32_0 : i32, i32
  }
  func.func @transform_2(%arg0: i32) -> (i32, i32, i32) {
    %c0_i32 = arith.constant 0 : i32
    %c0_i32_0 = arith.constant 0 : i32
    %c0_i32_1 = arith.constant 0 : i32
    return %arg0, %c0_i32, %c0_i32_0 : i32, i32, i32
  }
  func.func @transform_3(%arg0: i32) -> (i32, i32, i32) {
    %c0_i32 = arith.constant 0 : i32
    %c0_i32_0 = arith.constant 0 : i32
    %c0_i32_1 = arith.constant 0 : i32
    return %arg0, %c0_i32, %c0_i32_0 : i32, i32, i32
  }
}

</mosaic_0001>

<bundles_post_ra>
// kernel: model_forward.1
= control target key start
LH: loop header
LB: loop body
LE: loop exit
PB: predicated region body
PF: predicated region fallthrough
CT: control target
= control target key end

     0   :  { %8 = vsyncpa [#allocation3], 0  ;;  %s801_s0 = inlined_call_operand.vmem [shape: f32[4,8,6], index: 0, kind: input, shape index: {}]   ;;  %s802_s1 = inlined_call_operand.vmem [shape: f32[6,128], index: 1, kind: input, shape index: {}]   ;;  %s803_s2 = inlined_call_operand.vmem [shape: f32[4,8,8], index: 2, kind: input, shape index: {}]   ;;  %s804_s3 = inlined_call_operand.hbm [shape: f32[4,8,128], index: 3, kind: output, shape index: {}]  }
   0x1   :  { %10 = vsyncpa [#allocation3 + $0x1], 0  ;;  %s685_s12 = smov 0   ;;  %s687_s13 = smov 0  }
   0x2   :  { %s689_s14 = smov 0   ;;  %s691_s15 = smov 0  }
   0x3 LB: > { %s706_s16 = sadd.s32 4294967295, %s660_s15   ;;  %s516_s17 = sadd.s32 4294967294, %s660_s15   ;;  %s660_s15 = sphi %s691_s15, %s810_s15   ;;  %s656_s14 = sphi %s689_s14, %s809_s14   ;;  %s652_s13 = sphi %s687_s13, %s808_s13   ;;  %s648_s12 = sphi %s685_s12, %s807_s12  }
   0x4   : > { %s710_s18 = sadd.s32 1, %s660_s15   ;;  %s96_s19 = sadd.s32 1, %s656_s14 }
   0x5   : > { %s93_s20 = ssub.s32 %s660_s15, %s710_s18  ;;  %p106_p0 = scmp.ne.s32.totalorder %s656_s14, %s652_s13 }
   0x6   : > { %p94_p1 = scmp.eq.s32.totalorder %s93_s20, 0  ;;  %p107_p2 = scmp.eq.s32.totalorder %s706_s16, 3 }
   0x7   : > { %p112_p3 = scmp.ne.s32.totalorder %s652_s13, %s648_s12  ;;  %p113_p4 = scmp.eq.s32.totalorder %s516_s17, 3 }
   0x8   : > { %s721_s21 = scalar_select %p94_p1, %s656_s14, %s96_s19  }
   0x9   : > { %p723_p5 = por %p107_p2, %p106_p0  ;;  %p727_p6 = por %p113_p4, %p112_p3 }
   0xa   : > { %p519_p7 = scmp.ge.s32.totalorder %s660_s15, 1  ;;  %p148_p8 = scmp.lt.s32.totalorder %s660_s15, 5 }
   0xc   : > { %p149_p9 = pnand %p519_p7, %p148_p8 }
   0xd   : > { %v184_v0 = vld [vmem:[%s802_s1] sm:$0x3f] (!%p149_p9)  ;;  %vm189_vm0 = vcmask (!%p149_p9), 1045504   ;;  %p175_p10 = scmp.lt.s32.totalorder (!%p149_p9), %s706_s16, 3  ;;  %v662_v1 = vmov (!%p149_p9), 0.0   ;;  %vm663_vm1 = vmmov (!%p149_p9), 0  }
   0xe   : > { %152 = sbr.rel (%p149_p9) target bundleno = 1022 (0x3fe), region = 32  ;;  %536 = vmatprep.subr.mxu0 (!%p149_p9), %v662_v1  ;;  %538 = vmatprep.mubr.msk.f32.mxu0 (!%p149_p9), %vm663_vm1, %v662_v1  ;;  %vm185_vm2 = vcmask (!%p149_p9), 48128   ;;  %vm343_vm3 = vcmask (!%p149_p9), 64512   ;;  %s172_s7 = sand.u32 (!%p149_p9), 1, %s652_s13  }
   0xf   : > { %537 = vmatpush3.msk.msra.mxu0 (!%p149_p9), %vm189_vm0, %v184_v0  ;;  %541 = vmatprep.subr.mxu1 (!%p149_p9), %v662_v1  ;;  %s520_s8 = sshll.u32 (!%p149_p9), %s172_s7, 3  ;;  %s527_s11 = sshll.u32 (!%p149_p9), %s706_s16, 7 }
  0x10   : > { %546 = vmatprep.subr.mxu0 (!%p149_p9), %v662_v1  ;;  %543 = vmatprep.mubr.msk.f32.mxu1 (!%p149_p9), %vm663_vm1, %v662_v1  ;;  %s174_s9 = scalar_lea.vmem (!%p149_p9), [#allocation2], %s520_s8  ;;  %s761_s20 = scalar_lea.hbm (!%p149_p9), %s804_s3, %s527_s11 }
  0x11   : > { %s445_s10 = sshll.u32 (!%p149_p9), %s174_s9, 4  ;;  %s432_s24 = scalar_lea.sflag (!%p149_p9), [#allocation3], %s172_s7  ;;  %s756_s10 = int_to_ptr.vmem [resolvable:$true] %s445_s10 }
  0x12   : > { %s598_s25 = scalar_lea.vmem (!%p149_p9), %s756_s10, 128 }
  0x13   : > { %p599_p11 = scmp.ne.s32.totalorder (!%p149_p9), %s756_s10, %s598_s25 }
  0x15   : > { %s738_s26 = scalar_select %p175_p10, %s706_s16, 3 }
  0x16   : > { %p600_p12 = pnand %p599_p11, %p723_p5  ;;  %s664_s16 = smov [#allocation2]  }
  0x17   : > { %s521_s27 = sshll.u32 %s738_s26, 3  ;;  %s602_s26 = sshll.u32 %s664_s16, 4  ;;  %s603_s26 = int_to_ptr.vmem [resolvable:$false] %s602_s26 }
  0x18   : > { %s178_s30 = scalar_lea.vmem %s801_s0, %s521_s27  ;;  %s182_s6 = scalar_lea.vmem %s803_s2, %s521_s27 }
  0x19   : > { %v183_v2 = vld [vmem:[%s178_s30] sm:$0xff]  ;;  %p601_p13 = pneg %p600_p12  ;;  %s604_s27 = scalar_lea.vmem %s603_s26, 256 }
  0x1a   : > { %539 = vmatmul.mubr.msk.f32.vlgmr.msra.gmra.mrb[0].mxu0 %vm185_vm2, %v183_v2  ;;  %v355_v25 = vld [vmem:[%s182_s6] sm:$0xff]  ;;  %p605_p0 = scmp.lt.s32.totalorder %s756_s10, %s603_s26  ;;  %p606_p1 = scmp.lt.s32.totalorder %s604_s27, %s598_s25 }
  0x1b   : > { %548 = vmatprep.mubr.msk.f32.mxu0 %vm663_vm1, %v662_v1 }
  0x1c   : > { %p607_p2 = por %p606_p1, %p605_p0 }
  0x1e   : > { %p608_p3 = pnand %p607_p2, %p601_p13 }
  0xed   : > { %v259_v3 = vpop.f32.mrb[0].mxu0 }
  0xee   : > { %v264_v4 = vmul.f32 0.044715, %v259_v3  ;;  %v540_v5 = vpop.f32.mrb[1].mxu0  ;;  %v263_v11 = vmul.f32 0.5, %v259_v3 }
  0xf0   : > { %v265_v6 = vmul.f32 %v264_v4, %v259_v3 }
  0xf2   : > { %v266_v7 = vmul.f32 %v265_v6, %v259_v3 }
  0xf4   : > { %v267_v8 = vadd.f32 %v266_v7, %v259_v3 }
  0xf6   : > { %v268_v9 = vmul.f32 0.7978846, %v267_v8 }
  0xf8   : > { %592 = vtanh.f32 %v268_v9 }
 0x102   : > { %v593_v10 = vpop.eup %592 }
 0x103   : > { %v270_v12 = vadd.f32 1.0, %v593_v10 }
 0x105   : > { %v271_v13 = vmul.f32 %v270_v12, %v263_v11 }
 0x107   : > { %542 = vmatpush3.xpose.msra.mxu1 %v271_v13  ;;  %547 = vmatpush3.msra.mxu0 %v271_v13 }
 0x10a   : > { %544 = vmatmul.mubr.f32.vlgmr.msra.gmra.mrb[0].mxu1 %v271_v13 }
 0x1dd   : > { %v338_v14 = vpop.f32.mrb[0].mxu1 }
 0x1de   : > { %v342_v15 = vmul.f32 1.5650846, %v338_v14  ;;  %v545_v16 = vpop.f32.mrb[1].mxu1 }
 0x1e0   : > { %v344_v17 = vsel %vm343_vm3, %v342_v15, -inf }
 0x1e1   : > { %345 = vmax.xlane.f32.xlu0 %v344_v17 }
 0x26e   : > { %v346_v18 = vpop.xlane.xlu0 %345 }
 0x26f   : > { %v347_v19 = vsub.f32 %v342_v15, %v346_v18 }
 0x271   : > { %v348_v20 = vmul.f32 1.442695, %v347_v19 }
 0x273   : > { %594 = vpow2.f32 %v348_v20 }
 0x27d   : > { %v595_v21 = vpop.eup %594 }
 0x27e   : > { %v350_v22 = vsel %vm343_vm3, %v595_v21, 0.0 }
 0x27f   : > { %351 = vadd.xlane.f32.xlu0 %v350_v22 }
 0x30c   : > { %v352_v23 = vpop.xlane.xlu0 %351 }
 0x30d   : > { %596 = vrcp.f32 %v352_v23 }
 0x317   : > { %v597_v24 = vpop.eup %596 }
 0x318   : > { %v354_v26 = vmul.f32 %v597_v24, %v595_v21 }
 0x31a   : > { %v356_v27 = vmul.f32 %v355_v25, %v354_v26 }
 0x31c   : > { %549 = vmatmul.mubr.msk.f32.vlgmr.msra.gmra.mrb[2].mxu0 %vm343_vm3, %v356_v27 }
 0x3ef   : > { %v426_v28 = vpop.f32.mrb[2].mxu0 }
 0x3f0   : > { %430 = vst [vmem:[%s174_s9] sm:$0xff] %v426_v28  ;;  %v550_v29 = vpop.f32.mrb[3].mxu0 }
 0x3f1   : > { %611 = shalt.err (!%p608_p3)
}
 0x3f2   : > { %s612_s28 = scalar_lea.hbm %s761_s20, 128  ;;  %s616_s4 = scalar_lea.hbm %s804_s3, 512 }
 0x3f3   : > { %p613_p4 = scmp.ne.s32.totalorder %s761_s20, %s612_s28  ;;  %p617_p9 = scmp.lt.u32.totalorder %s761_s20, %s804_s3 }
 0x3f4   : > { %p618_p10 = scmp.lt.u32.totalorder %s616_s4, %s612_s28  ;;  %p620_p12 = scmp.lt.u32.totalorder %s612_s28, %s761_s20 }
 0x3f5   : > { %p614_p7 = pnand %p613_p4, %p723_p5 }
 0x3f6   : > { %p619_p11 = por %p618_p10, %p617_p9 }
 0x3f7   : > { %p615_p8 = pneg %p614_p7 }
 0x3f8   : > { %p621_p13 = por %p620_p12, %p619_p11 }
 0x3fa   : > { %p622_p0 = pnand %p621_p13, %p615_p8 }
 0x3fc   : > { %625 = shalt.err (!%p622_p0)
}
 0x3fd   : > { %551 = dma.vmem_to_hbm [thread:$0]  (%p723_p5), %s756_s10, 128, %s761_s20, %s432_s24  }
 0x3fe PF: > { %p557_p1 = scmp.ge.s32.totalorder %s660_s15, 2  ;;  %s457_s7 = sand.u32 1, %s648_s12  }
 0x3ff   : > { %s458_s8 = scalar_lea.sflag [#allocation3], %s457_s7 }
 0x400   : > { %p554_p2 = pnand %p557_p1, %p727_p6 }
 0x402   : > { %643 = dma.done.wait (!%p554_p2), %s458_s8, 128  }
 0x403   : > { %645 = vsyncadd (!%p554_p2), %s458_s8, 4294967168  ;;  %p13_p3 = scmp.ge.s32.totalorder %s710_s18, 6   ;;  %s807_s12 = smov %s652_s13 }
 0x404   : > { %s808_s13 = smov %s656_s14  ;;  %s809_s14 = smov %s721_s21 }
 0x405   : > { %s810_s15 = smov %s710_s18  ;;  %15 = sbr.rel (!%p13_p3) target bundleno = 3 (0x3), region = 70 }
 0x40c   :  { %463 = vsyncpa [#allocation3], 1 }
 0x40d   :  { %465 = vsyncpa [#allocation3 + $0x1], 1 }

</bundles_post_ra>
